<compile_context>
chip_gen: v5e
topology: v5e:2x2
jax: 0.10.0
libtpu: 0.0.40
codegen_flags: <defaults>
</compile_context>

<pallas_src>
import functools

import jax
import jax.numpy as jnp
from jax.experimental import pallas as pl
from jax.experimental.pallas import tpu as pltpu

MAX_SPIKE_TIME = 100000.0


def _snn_kernel(x_ref, rank_ref, w_ref, o_ref, *, max_spike_time):
    """One block of Bt batch rows per grid step.

    x_ref    : (Bt, 1, n)   scaled + bias-appended input values (unsorted)
    rank_ref : (Bt, 1, n)   int32 rank of each input in ascending sort order
    w_ref    : (n, out)     weight matrix (grid-resident)
    o_ref    : (Bt, 1, out) output spike times
    """
    bt = x_ref.shape[0]
    n = x_ref.shape[2]
    out_size = w_ref.shape[1]

    x = x_ref[...]                      # (Bt, 1, n) f32
    rank = rank_ref[...]                # (Bt, 1, n) i32
    w = w_ref[...]                      # (n, out)   f32

    # i = cumulative (sorted) index on dim 1, broadcast over input lanes j.
    i_iota = jax.lax.broadcasted_iota(jnp.int32, (bt, n, n), 1)
    le_i = rank <= i_iota               # (Bt, n, n)  rank[b, j] <= i
    gt_i = jnp.logical_not(le_i)        # rank[b, j] >  i
    ge_i = rank >= i_iota               # rank[b, j] >= i

    # Sorted values / left-shifted sorted values, recovered with masked
    # lane-min reductions (XLU) instead of extra strided input streams:
    #   xs[b, i] = min{ x[b, j] : rank[b, j] >= i }
    #   xl[b, i] = min{ x[b, j] : rank[b, j] >  i }   (MAX_SPIKE_TIME if empty)
    xs3 = jnp.min(jnp.where(ge_i, x, jnp.inf), axis=2, keepdims=True)         # (Bt, n, 1)
    xl3 = jnp.min(jnp.where(gt_i, x, max_spike_time), axis=2, keepdims=True)  # (Bt, n, 1)

    # Fused gather + cumulative sums as two rank-mask matmuls (MXU, f32 acc):
    #   w_sum[b, i, :]  = sum_j [rank[b,j] <= i] * W[j, :]
    #   wi_sum[b, i, :] = sum_j [rank[b,j] <= i] * x[b,j] * W[j, :]
    a_mask = le_i.astype(jnp.float32)                 # (Bt, n, n)
    b_mask = a_mask * x                               # (Bt, n, n)
    w_b = jnp.broadcast_to(w, (bt, n, out_size))      # hoisted once per step
    w_sum = jnp.einsum('bij,bjo->bio', a_mask, w_b,
                       preferred_element_type=jnp.float32)    # (Bt, n, out)
    wi_sum = jnp.einsum('bij,bjo->bio', b_mask, w_b,
                        preferred_element_type=jnp.float32)   # (Bt, n, out)

    # Spike-time selection chain + min over the sorted axis.
    inv_den = pl.reciprocal(jnp.maximum(w_sum - 1.0, 1e-10), approx=False)
    out_all = wi_sum * inv_den
    out_ws = jnp.where(w_sum < 1.0, max_spike_time, out_all)
    out_large = jnp.where(out_ws < xs3, max_spike_time, out_ws)
    out_valid = jnp.where(out_large > xl3, max_spike_time, out_large)

    o_ref[...] = jnp.min(out_valid, axis=1, keepdims=True)    # (Bt, 1, out)


def _pick_block_b(batch, n, out_size, vmem_budget_bytes=12 << 20):
    """Largest batch block whose in-kernel temporaries fit the VMEM budget,
    while keeping >= 2 grid steps (both megacore TCs get work) when B >= 2."""
    if batch <= 1:
        return 1
    # Dominant per-row temporaries: ~6 (n, n) f32 (rank masks + where temps)
    # and ~5 (n, out) f32 (matmul results + spike-selection chain).
    per_row_bytes = 4 * (6 * n * n + 5 * n * out_size)
    bt = max(1, vmem_budget_bytes // max(per_row_bytes, 1))
    bt = min(bt, (batch + 1) // 2, 128)
    return max(1, int(bt))


def snn_layer_forward(x, weight, delay, *, block_b=None):
    """Forward pass of SNNLayer.  x: (batch, in_size_real) -> (batch, out_size)."""
    B = x.shape[0]
    n, out_size = weight.shape

    # Elementwise delay scaling + bias append (plain JAX glue; the argsort
    # below needs the scaled values anyway, so there is nothing left to fuse).
    x = x * jnp.exp(jax.nn.relu(delay))
    x = jnp.concatenate([x, jnp.ones((B, 1), x.dtype)], axis=1)       # (B, n)

    # TODO(synk): torch.sort has no Mosaic lowering; the argsort runs in plain
    # JAX.  Only the ranks enter the kernel — the gather, both cumulative sums,
    # the sorted / left-shifted values and the spike logic are all in-kernel.
    idx = jnp.argsort(x, axis=1)
    rank = jnp.argsort(idx, axis=1).astype(jnp.int32)                 # (B, n)

    bt = _pick_block_b(B, n, out_size) if block_b is None else block_b
    n_steps = pl.cdiv(B, bt)
    b_pad = n_steps * bt
    if b_pad != B:                       # pad batch to a multiple of the block
        pad = b_pad - B
        x = jnp.pad(x, ((0, pad), (0, 0)))
        rank = jnp.pad(rank, ((0, pad), (0, 0)))

    x_row = x[:, None, :]                # (B_pad, 1, n)  lane-dense
    rank_row = rank[:, None, :]          # (B_pad, 1, n)

    out = pl.pallas_call(
        functools.partial(_snn_kernel, max_spike_time=MAX_SPIKE_TIME),
        out_shape=jax.ShapeDtypeStruct((b_pad, 1, out_size), jnp.float32),
        grid=(n_steps,),
        in_specs=[
            pl.BlockSpec((bt, 1, n), lambda b: (b, 0, 0)),        # x (unsorted)
            pl.BlockSpec((bt, 1, n), lambda b: (b, 0, 0)),        # ranks
            pl.BlockSpec((n, out_size), lambda b: (0, 0)),        # weight (resident)
        ],
        out_specs=pl.BlockSpec((bt, 1, out_size), lambda b: (b, 0, 0)),
        compiler_params=pltpu.CompilerParams(
            dimension_semantics=("parallel",)),
    )(x_row, rank_row, weight)

    return out[:B, 0, :]


def snn_layer_reference(x, weight, delay):
    """Pure-JAX replica of the PyTorch forward (for correctness check)."""
    B = x.shape[0]
    x = x * jnp.exp(jax.nn.relu(delay))
    x = jnp.concatenate([x, jnp.ones((B, 1), x.dtype)], axis=1)
    idx = jnp.argsort(x, axis=1)
    xs = jnp.take_along_axis(x, idx, axis=1)
    w_sorted = weight[idx]                                   # (B, n, out)
    xs3 = xs[:, :, None]                                     # (B, n, 1)
    w_sum = jnp.cumsum(w_sorted, axis=1)
    wi_sum = jnp.cumsum(w_sorted * xs3, axis=1)
    out_all = wi_sum / jnp.maximum(w_sum - 1.0, 1e-10)
    out_ws = jnp.where(w_sum < 1.0, MAX_SPIKE_TIME, out_all)
    out_large = jnp.where(out_ws < xs3, MAX_SPIKE_TIME, out_ws)
    x_left = jnp.concatenate(
        [xs3[:, 1:, :], jnp.full((B, 1, 1), MAX_SPIKE_TIME, xs.dtype)], axis=1)
    out_valid = jnp.where(out_large > x_left, MAX_SPIKE_TIME, out_large)
    return jnp.min(out_valid, axis=1)


if __name__ == "__main__":
    batch = 4
    in_size_real = 32
    out_size = 16
    in_size = in_size_real + 1

    key = jax.random.PRNGKey(0)
    k_x, k_w, k_d = jax.random.split(key, 3)

    # Deterministic parameter init mirroring the PyTorch __init__ shapes.
    bound = (6.0 / (in_size + out_size)) ** 0.5          # xavier_uniform_
    weight = jax.random.uniform(
        k_w, (in_size, out_size), jnp.float32, minval=-bound, maxval=bound)
    delay = jax.random.normal(k_d, (in_size_real,), jnp.float32) / (
        in_size_real ** 0.5)

    # Spike-time-coded inputs (positive times).
    x = jax.random.uniform(k_x, (batch, in_size_real), jnp.float32)

    out = snn_layer_forward(x, weight, delay)
    out = jax.block_until_ready(out)

    ref = snn_layer_reference(x, weight, delay)
    assert out.shape == (batch, out_size), out.shape
    assert jnp.all(jnp.isfinite(out))
    assert jnp.allclose(out, ref, rtol=2e-2, atol=1e-3), (out, ref)

    print("KERNEL_OK")
</pallas_src>

<mosaic_0001>
module attributes {stable_mosaic.version = 11 : i64} {
  func.func @_snn_kernel(%arg0: i32, %arg1: memref<2x1x33xf32, #tpu.memory_space<vmem>>, %arg2: memref<2x1x33xi32, #tpu.memory_space<vmem>>, %arg3: memref<33x16xf32, #tpu.memory_space<vmem>>, %arg4: memref<2x1x16xf32, #tpu.memory_space<vmem>>) attributes {dimension_semantics = [#tpu.dimension_semantics<parallel>], iteration_bounds = array<i64: 2>, scalar_prefetch = 0 : i64, scratch_operands = 0 : i64, tpu.core_type = #tpu.core_type<tc>, window_params = [{transform_indices = @transform_0, window_bounds = array<i64: 2, 1, 33>}, {transform_indices = @transform_1, window_bounds = array<i64: 2, 1, 33>}, {pipeline_mode = #tpu.pipeline_mode<synchronous>, transform_indices = @transform_2, window_bounds = array<i64: 33, 16>}, {transform_indices = @transform_3, window_bounds = array<i64: 2, 1, 16>}]} {
    %c0 = arith.constant 0 : index
    %c0_0 = arith.constant 0 : index
    %c0_1 = arith.constant 0 : index
    %0 = vector.load %arg1[%c0, %c0_0, %c0_1] : memref<2x1x33xf32, #tpu.memory_space<vmem>>, vector<2x1x33xf32>
    %c0_2 = arith.constant 0 : index
    %c0_3 = arith.constant 0 : index
    %c0_4 = arith.constant 0 : index
    %1 = vector.load %arg2[%c0_2, %c0_3, %c0_4] : memref<2x1x33xi32, #tpu.memory_space<vmem>>, vector<2x1x33xi32>
    %c0_5 = arith.constant 0 : index
    %c0_6 = arith.constant 0 : index
    %2 = vector.load %arg3[%c0_5, %c0_6] : memref<33x16xf32, #tpu.memory_space<vmem>>, vector<33x16xf32>
    %3 = tpu.iota {dimensions = array<i32: 1>} : vector<2x33x33xi32>
    %4 = vector.broadcast %1 : vector<2x1x33xi32> to vector<2x33x33xi32>
    %5 = arith.cmpi sle, %4, %3 : vector<2x33x33xi32>
    %cst = arith.constant dense<true> : vector<2x33x33xi1>
    %6 = arith.xori %5, %cst : vector<2x33x33xi1>
    %7 = vector.broadcast %1 : vector<2x1x33xi32> to vector<2x33x33xi32>
    %8 = arith.cmpi sge, %7, %3 : vector<2x33x33xi32>
    %cst_7 = arith.constant 0x7F800000 : f32
    %9 = vector.shape_cast %0 : vector<2x1x33xf32> to vector<2x1x33xf32>
    %10 = vector.broadcast %9 : vector<2x1x33xf32> to vector<2x33x33xf32>
    %11 = vector.broadcast %cst_7 : f32 to vector<2x33x33xf32>
    %12 = arith.select %8, %10, %11 : vector<2x33x33xi1>, vector<2x33x33xf32>
    %cst_8 = arith.constant dense<0x7F800000> : vector<2x33xf32>
    %13 = vector.multi_reduction <minimumf>, %12, %cst_8 [2] : vector<2x33x33xf32> to vector<2x33xf32>
    %14 = vector.shape_cast %13 : vector<2x33xf32> to vector<2x33x1xf32>
    %cst_9 = arith.constant 1.000000e+05 : f32
    %15 = vector.shape_cast %0 : vector<2x1x33xf32> to vector<2x1x33xf32>
    %16 = vector.broadcast %15 : vector<2x1x33xf32> to vector<2x33x33xf32>
    %17 = vector.broadcast %cst_9 : f32 to vector<2x33x33xf32>
    %18 = arith.select %6, %16, %17 : vector<2x33x33xi1>, vector<2x33x33xf32>
    %cst_10 = arith.constant dense<0x7F800000> : vector<2x33xf32>
    %19 = vector.multi_reduction <minimumf>, %18, %cst_10 [2] : vector<2x33x33xf32> to vector<2x33xf32>
    %20 = vector.shape_cast %19 : vector<2x33xf32> to vector<2x33x1xf32>
    %21 = arith.extui %5 : vector<2x33x33xi1> to vector<2x33x33xi32>
    %22 = arith.sitofp %21 : vector<2x33x33xi32> to vector<2x33x33xf32>
    %23 = vector.broadcast %0 : vector<2x1x33xf32> to vector<2x33x33xf32>
    %24 = arith.mulf %22, %23 : vector<2x33x33xf32>
    %25 = vector.shape_cast %2 : vector<33x16xf32> to vector<1x33x16xf32>
    %26 = vector.broadcast %25 : vector<1x33x16xf32> to vector<2x33x16xf32>
    "tpu.trace_start"() <{level = 10 : i32, message = "bij,bjo->bio"}> : () -> ()
    %cst_11 = arith.constant dense<0.000000e+00> : vector<2x33x16xf32>
    %27 = tpu.matmul %22, %26, %cst_11 {dimension_numbers = #tpu.dot_dimension_numbers<[2], [1], [1], [2], [0, 0, 0, 1, 1, 2], [0], [0]>} : vector<2x33x33xf32>, vector<2x33x16xf32>, vector<2x33x16xf32> -> vector<2x33x16xf32>
    %cst_12 = arith.constant dense<0.000000e+00> : vector<2x33x16xf32>
    %28 = tpu.matmul %24, %26, %cst_12 {dimension_numbers = #tpu.dot_dimension_numbers<[2], [1], [1], [2], [0, 0, 0, 1, 1, 2], [0], [0]>} : vector<2x33x33xf32>, vector<2x33x16xf32>, vector<2x33x16xf32> -> vector<2x33x16xf32>
    "tpu.trace_stop"() : () -> ()
    %cst_13 = arith.constant 1.000000e+00 : f32
    %29 = vector.broadcast %cst_13 : f32 to vector<2x33x16xf32>
    %30 = arith.subf %27, %29 : vector<2x33x16xf32>
    %cst_14 = arith.constant 1.000000e-10 : f32
    %31 = vector.broadcast %cst_14 : f32 to vector<2x33x16xf32>
    %32 = arith.maximumf %30, %31 : vector<2x33x16xf32>
    %33 = tpu.reciprocal %32 : vector<2x33x16xf32> -> vector<2x33x16xf32>
    %34 = arith.mulf %28, %33 : vector<2x33x16xf32>
    %cst_15 = arith.constant 1.000000e+00 : f32
    %35 = vector.broadcast %cst_15 : f32 to vector<2x33x16xf32>
    %36 = arith.cmpf olt, %27, %35 : vector<2x33x16xf32>
    %cst_16 = arith.constant 1.000000e+05 : f32
    %37 = vector.broadcast %cst_16 : f32 to vector<2x33x16xf32>
    %38 = arith.select %36, %37, %34 : vector<2x33x16xi1>, vector<2x33x16xf32>
    %39 = vector.broadcast %14 : vector<2x33x1xf32> to vector<2x33x16xf32>
    %40 = arith.cmpf olt, %38, %39 : vector<2x33x16xf32>
    %cst_17 = arith.constant 1.000000e+05 : f32
    %41 = vector.broadcast %cst_17 : f32 to vector<2x33x16xf32>
    %42 = arith.select %40, %41, %38 : vector<2x33x16xi1>, vector<2x33x16xf32>
    %43 = vector.broadcast %20 : vector<2x33x1xf32> to vector<2x33x16xf32>
    %44 = arith.cmpf ogt, %42, %43 : vector<2x33x16xf32>
    %cst_18 = arith.constant 1.000000e+05 : f32
    %45 = vector.broadcast %cst_18 : f32 to vector<2x33x16xf32>
    %46 = arith.select %44, %45, %42 : vector<2x33x16xi1>, vector<2x33x16xf32>
    %cst_19 = arith.constant dense<0x7F800000> : vector<2x16xf32>
    %47 = vector.multi_reduction <minimumf>, %46, %cst_19 [1] : vector<2x33x16xf32> to vector<2x16xf32>
    %48 = vector.shape_cast %47 : vector<2x16xf32> to vector<2x1x16xf32>
    %c0_20 = arith.constant 0 : index
    %c0_21 = arith.constant 0 : index
    %c0_22 = arith.constant 0 : index
    %49 = vector.load %arg4[%c0_20, %c0_21, %c0_22] : memref<2x1x16xf32, #tpu.memory_space<vmem>>, vector<2x1x16xf32>
    tpu.vector_store %arg4[%c0_20, %c0_21, %c0_22], %48 {strides = array<i32>} : memref<2x1x16xf32, #tpu.memory_space<vmem>>, vector<2x1x16xf32>,
    return
  }
  func.func @transform_0(%arg0: i32) -> (i32, i32, i32) {
    %c0_i32 = arith.constant 0 : i32
    %c0_i32_0 = arith.constant 0 : i32
    %c0_i32_1 = arith.constant 0 : i32
    return %arg0, %c0_i32, %c0_i32_0 : i32, i32, i32
  }
  func.func @transform_1(%arg0: i32) -> (i32, i32, i32) {
    %c0_i32 = arith.constant 0 : i32
    %c0_i32_0 = arith.constant 0 : i32
    %c0_i32_1 = arith.constant 0 : i32
    return %arg0, %c0_i32, %c0_i32_0 : i32, i32, i32
  }
  func.func @transform_2(%arg0: i32) -> (i32, i32) {
    %c0_i32 = arith.constant 0 : i32
    %c0_i32_0 = arith.constant 0 : i32
    %c0_i32_1 = arith.constant 0 : i32
    return %c0_i32, %c0_i32_0 : i32, i32
  }
  func.func @transform_3(%arg0: i32) -> (i32, i32, i32) {
    %c0_i32 = arith.constant 0 : i32
    %c0_i32_0 = arith.constant 0 : i32
    %c0_i32_1 = arith.constant 0 : i32
    return %arg0, %c0_i32, %c0_i32_0 : i32, i32, i32
  }
}

</mosaic_0001>

<bundles_post_ra>
// kernel: tpu_custom_call.1
= control target key start
LH: loop header
LB: loop body
LE: loop exit
PB: predicated region body
PF: predicated region fallthrough
CT: control target
= control target key end

     0   :  { %8 = vsyncpa [#allocation3], 0  ;;  %s1731_s0 = inlined_call_operand.vmem [shape: f32[4,1,33], index: 0, kind: input, shape index: {}]   ;;  %s1732_s1 = inlined_call_operand.vmem [shape: s32[4,1,33], index: 1, kind: input, shape index: {}]   ;;  %s1733_s2 = inlined_call_operand.vmem [shape: f32[33,16], index: 2, kind: input, shape index: {}]   ;;  %s1734_s3 = inlined_call_operand.hbm [shape: f32[4,1,16], index: 3, kind: output, shape index: {}]  }
   0x1   :  { %10 = vsyncpa [#allocation3 + $0x1], 0  ;;  %s1102_s12 = smov 0   ;;  %s1104_s13 = smov 0  }
   0x2   :  { %s1106_s14 = smov 0   ;;  %s1108_s15 = smov 0  }
   0x3 LB: > { %s891_s16 = sadd.s32 4294967295, %s1076_s15   ;;  %s892_s17 = sadd.s32 4294967294, %s1076_s15   ;;  %s1076_s15 = sphi %s1108_s15, %s1760_s15   ;;  %s1072_s14 = sphi %s1106_s14, %s1759_s14   ;;  %s1068_s13 = sphi %s1104_s13, %s1758_s13   ;;  %s1064_s12 = sphi %s1102_s12, %s1757_s12  }
   0x4   : > { %s1125_s18 = sadd.s32 1, %s1076_s15   ;;  %s96_s19 = sadd.s32 1, %s1072_s14 }
   0x5   : > { %s93_s20 = ssub.s32 %s1076_s15, %s1125_s18  ;;  %p106_p0 = scmp.ne.s32.totalorder %s1072_s14, %s1068_s13 }
   0x6   : > { %p94_p1 = scmp.eq.s32.totalorder %s93_s20, 0  ;;  %p107_p2 = scmp.eq.s32.totalorder %s891_s16, 1 }
   0x7   : > { %p112_p3 = scmp.ne.s32.totalorder %s1068_s13, %s1064_s12  ;;  %p113_p4 = scmp.eq.s32.totalorder %s892_s17, 1 }
   0x8   : > { %s1135_s21 = scalar_select %p94_p1, %s1072_s14, %s96_s19  }
   0x9   : > { %p1137_p5 = por %p107_p2, %p106_p0  ;;  %p1141_p6 = por %p113_p4, %p112_p3 }
   0xa   : > { %p895_p7 = scmp.ge.s32.totalorder %s1076_s15, 1  ;;  %p150_p8 = scmp.lt.s32.totalorder %s1076_s15, 3 }
   0xc   : > { %p151_p9 = pnand %p895_p7, %p150_p8 }
   0xd   : > { %s1153_s28 = sshll.u32 (!%p151_p9), %s891_s16, 1  ;;  %s174_s20 = sand.u32 (!%p151_p9), 1, %s1068_s13  }
   0xe   : > { %154 = sbr.rel (%p151_p9) target bundleno = 244 (0xf4), region = 32  ;;  %p178_p10 = scmp.lt.s32.totalorder (!%p151_p9), %s1153_s28, 3 }
   0xf   : > { %s896_s24 = sshll.u32 (!%p151_p9), %s174_s20, 1  ;;  %s820_s27 = scalar_lea.hbm (!%p151_p9), %s1734_s3, %s1153_s28 }
  0x10   : > { %s176_s29 = scalar_lea.vmem (!%p151_p9), [#allocation2], %s896_s24  ;;  %s810_s5 = scalar_lea.sflag (!%p151_p9), [#allocation3], %s174_s20 }
  0x11   : > { %s821_s30 = sshll.u32 (!%p151_p9), %s176_s29, 4  ;;  %s1034_s9 = scalar_lea.hbm (!%p151_p9), %s1734_s3, 4  ;;  %s822_s30 = int_to_ptr.vmem [resolvable:$true] %s821_s30 }
  0x13   : > { %v196_v0 = vld [vmem:[%s1733_s2 + $0x20] sm:$0x1]  ;;  %vm368_vm0 = vcmask 1040384   ;;  %v195_v1 = vld [vmem:[%s1733_s2 + $0x18] sm:$0xff]  ;;  %v197_v2 = vlaneseq  ;;  %v194_v3 = vld [vmem:[%s1733_s2 + $0x10] sm:$0xff]  ;;  %s179_s4 = scalar_select %p178_p10, %s1153_s28, 3 }
  0x14   : > { %909 = vmatpush.msk.msra.mxu0 %vm368_vm0, %v196_v0  ;;  %915 = vmatpush.msk.msra.mxu1 %vm368_vm0, %v196_v0  ;;  %v193_v5 = vld [vmem:[%s1733_s2 + $0x8] sm:$0xff]  ;;  %v192_v6 = vld [vmem:[%s1733_s2] sm:$0xff]  ;;  %vm251_vm1 = vcmask 269312   ;;  %v1078_v14 = vmov 0.0  }
  0x15   : > { %v1159_v4 = vshrl.u32 %v197_v2, 7  ;;  %921 = vmatpush.msk.msra.mxu2 %vm368_vm0, %v196_v0  ;;  %927 = vmatpush.msk.msra.mxu3 %vm368_vm0, %v196_v0  ;;  %s180_s11 = scalar_lea.vmem %s1731_s0, %s179_s4  ;;  %s185_s19 = scalar_lea.vmem %s1732_s1, %s179_s4  ;;  %vm264_vm0 = vcmask 262144  }
  0x16   : > { %384 = vmatpush.msra.mxu0 %v195_v1  ;;  %431 = vmatpush.msra.mxu1 %v195_v1  ;;  %v1177_v8 = vld [vmem:[%s185_s19] ss:$0 sm:$0xff]  ;;  %v1181_v10 = vld [vmem:[%s185_s19 + $0x1] ss:$0 sm:$0xff]  ;;  %s823_s4 = sshll.u32 %s820_s27, 4  ;;  %s824_s4 = int_to_ptr.hbm [resolvable:$true] %s823_s4 }
  0x17   : > { %478 = vmatpush.msra.mxu2 %v195_v1  ;;  %525 = vmatpush.msra.mxu3 %v195_v1  ;;  %v1175_v7 = vadd.s32 8, %v1159_v4  ;;  %v1179_v9 = vld [vmem:[%s180_s11] ss:$0 sm:$0xff]  ;;  %v1184_v11 = vadd.s32 24, %v1159_v4  ;;  %vm205_vm2 = vcmp.le.s32.totalorder %v1177_v8, %v1159_v4  ;;  %vm225_vm4 = vcmp.ge.s32.totalorder %v1177_v8, %v1159_v4  ;;  %v1195_v13 = vld [vmem:[%s180_s11 + $0x1] ss:$0 sm:$0xff] }
  0x18   : > { %385 = vmatpush.msra.mxu0 %v194_v3  ;;  %432 = vmatpush.msra.mxu1 %v194_v3  ;;  %v1193_v12 = vadd.s32 16, %v1159_v4  ;;  %v899_v15 = vsel %vm205_vm2, 1.0, %v1078_v14  ;;  %vm210_vm5 = vcmp.le.s32.totalorder %v1181_v10, %v1159_v4  ;;  %v241_v17 = vsel %vm225_vm4, %v1179_v9, inf  ;;  %s1028_s6 = sshra.s32 %s824_s4, 4  ;;  %s1029_s6 = int_to_ptr.hbm [resolvable:$true] %s1028_s6 }
  0x19   : > { %479 = vmatpush.msra.mxu2 %v194_v3  ;;  %526 = vmatpush.msra.mxu3 %v194_v3  ;;  %vm226_vm3 = vcmp.ge.s32.totalorder %v1177_v8, %v1175_v7  ;;  %v343_v18 = vmul.f32 %v1179_v9, %v899_v15  ;;  %v904_v19 = vsel %vm210_vm5, 1.0, %v1078_v14  ;;  %v252_v21 = vsel %vm251_vm1, %v241_v17, inf  ;;  %s1030_s28 = scalar_lea.hbm %s1029_s6, 2  ;;  %p1035_p0 = scmp.lt.s32.totalorder %s1029_s6, %s1734_s3 }
  0x1a   : > { %386 = vmatpush.msra.mxu0 %v193_v5  ;;  %433 = vmatpush.msra.mxu1 %v193_v5  ;;  %v242_v16 = vsel %vm226_vm3, %v1179_v9, inf  ;;  %v348_v22 = vmul.f32 %v1195_v13, %v904_v19  ;;  %vm206_vm6 = vcmp.le.s32.totalorder %v1177_v8, %v1175_v7  ;;  %vm230_vm7 = vcmp.ge.s32.totalorder %v1181_v10, %v1159_v4  ;;  %p1031_p11 = scmp.ne.s32.totalorder %s1029_s6, %s1030_s28  ;;  %p1036_p1 = scmp.lt.s32.totalorder %s1034_s9, %s1030_s28 }
  0x1b   : > { %480 = vmatpush.msra.mxu2 %v193_v5  ;;  %527 = vmatpush.msra.mxu3 %v193_v5  ;;  %v255_v20 = vsel %vm251_vm1, %v242_v16, inf  ;;  %vm228_vm8 = vcmp.ge.s32.totalorder %v1177_v8, %v1184_v11  ;;  %vm211_vm9 = vcmp.le.s32.totalorder %v1181_v10, %v1175_v7  ;;  %v246_v23 = vsel %vm230_vm7, %v1195_v13, inf }
  0x1c   : > { %387 = vmatpush.msra.mxu0 %v192_v6  ;;  %434 = vmatpush.msra.mxu1 %v192_v6  ;;  %v244_v24 = vsel %vm228_vm8, %v1179_v9, inf  ;;  %v268_v25 = vsel %vm251_vm1, %v246_v23, inf  ;;  %vm227_vm10 = vcmp.ge.s32.totalorder %v1177_v8, %v1193_v12  ;;  %v900_v26 = vsel %vm206_vm6, 1.0, %v1078_v14  ;;  %p1032_p12 = pnand %p1031_p11, %p1137_p5  ;;  %p1037_p2 = por %p1036_p1, %p1035_p0 }
  0x1d   : > { %481 = vmatpush.msra.mxu2 %v192_v6  ;;  %528 = vmatpush.msra.mxu3 %v192_v6  ;;  %v243_v27 = vsel %vm227_vm10, %v1179_v9, inf  ;;  %vm232_vm11 = vcmp.ge.s32.totalorder %v1181_v10, %v1193_v12  ;;  %v1238_v28 = vadd.s32 32, %v1159_v4  ;;  %v344_v29 = vmul.f32 %v1179_v9, %v900_v26 }
  0x1e   : > { %910 = vmatmul.msk.f32.vlgmr.msra.gmra.mxu0 %vm251_vm1, %v899_v15  ;;  %916 = vmatmul.msk.f32.vlgmr.msra.gmra.mxu1 %vm251_vm1, %v904_v19  ;;  %v905_v30 = vsel %vm211_vm9, 1.0, %v1078_v14  ;;  %v261_v31 = vsel %vm251_vm1, %v244_v24, inf  ;;  %v258_v33 = vsel %vm251_vm1, %v243_v27, inf  ;;  %v248_v34 = vsel %vm232_vm11, %v1195_v13, inf  ;;  %p1033_p13 = pneg %p1032_p12 }
  0x1f   : > { %256 = vmin.xlane.f32.xlu2 %v255_v20  ;;  %253 = vmin.xlane.f32.xlu0 %v252_v21  ;;  %v349_v32 = vmul.f32 %v1195_v13, %v905_v30  ;;  %vm233_vm12 = vcmp.ge.s32.totalorder %v1181_v10, %v1184_v11  ;;  %vm229_vm13 = vcmp.ge.s32.totalorder %v1177_v8, %v1238_v28  ;;  %v274_v35 = vsel %vm251_vm1, %v248_v34, inf }
  0x20   : > { %922 = vmatmul.msk.f32.vlgmr.msra.gmra.mxu2 %vm251_vm1, %v343_v18  ;;  %928 = vmatmul.msk.f32.vlgmr.msra.gmra.mxu3 %vm251_vm1, %v348_v22  ;;  %vm207_vm14 = vcmp.le.s32.totalorder %v1177_v8, %v1193_v12  ;;  %vm212_vm15 = vcmp.le.s32.totalorder %v1181_v10, %v1193_v12  ;;  %v249_v36 = vsel %vm233_vm12, %v1195_v13, inf  ;;  %v245_v37 = vsel %vm229_vm13, %v1179_v9, inf  ;;  %p1038_p3 = pnand %p1037_p2, %p1033_p13 }
  0x21   : > { %269 = vmin.xlane.f32.xlu1 %v268_v25  ;;  %vm231_vm3 = vcmp.ge.s32.totalorder %v1181_v10, %v1175_v7  ;;  %v901_v38 = vsel %vm207_vm14, 1.0, %v1078_v14  ;;  %v906_v40 = vsel %vm212_vm15, 1.0, %v1078_v14  ;;  %v277_v41 = vsel %vm251_vm1, %v249_v36, inf }
  0x22   : > { %v345_v39 = vmul.f32 %v1179_v9, %v901_v38  ;;  %v350_v42 = vmul.f32 %v1195_v13, %v906_v40  ;;  %v265_v43 = vsel %vm264_vm0, %v245_v37, inf  ;;  %v247_v44 = vsel %vm231_vm3, %v1195_v13, inf }
  0x23   : > { %vm1079_vm4 = vmmov 1   ;;  %vm234_vm8 = vcmp.ge.s32.totalorder %v1181_v10, %v1238_v28  ;;  %vm208_vm10 = vcmp.le.s32.totalorder %v1177_v8, %v1184_v11  ;;  %v271_v46 = vsel %vm251_vm1, %v247_v44, inf }
  0x24   : > { %vm1284_vm7 = vmxor %vm207_vm14, %vm1079_vm4  ;;  %vm213_vm11 = vcmp.le.s32.totalorder %v1181_v10, %v1184_v11  ;;  %v250_v48 = vsel %vm234_vm8, %v1195_v13, inf  ;;  %v902_v50 = vsel %vm208_vm10, 1.0, %v1078_v14  ;;  %vm209_vm14 = vcmp.le.s32.totalorder %v1177_v8, %v1238_v28 }
  0x25   : > { %v285_v47 = vsel %vm1284_vm7, %v1179_v9, 100000.0  ;;  %vm1306_vm12 = vmxor %vm205_vm2, %vm1079_vm4  ;;  %v346_v51 = vmul.f32 %v1179_v9, %v902_v50  ;;  %v907_v52 = vsel %vm213_vm11, 1.0, %v1078_v14  ;;  %v280_v55 = vsel %vm264_vm0, %v250_v48, inf }
  0x26   : > { %911 = vmatmul.msk.f32.gmra.mxu0 %vm251_vm1, %v900_v26  ;;  %917 = vmatmul.msk.f32.gmra.mxu1 %vm251_vm1, %v905_v30  ;;  %v299_v53 = vsel %vm251_vm1, %v285_v47, inf  ;;  %v351_v54 = vmul.f32 %v1195_v13, %v907_v52  ;;  %v283_v56 = vsel %vm1306_vm12, %v1179_v9, 100000.0  ;;  %vm1330_vm2 = vmxor %vm206_vm6, %vm1079_vm4  ;;  %vm214_vm6 = vcmp.le.s32.totalorder %v1181_v10, %v1238_v28 }
  0x27   : > { %262 = vmin.xlane.f32.xlu2 %v261_v31  ;;  %259 = vmin.xlane.f32.xlu0 %v258_v33  ;;  %vm1339_vm13 = vmxor %vm210_vm5, %vm1079_vm4  ;;  %v293_v59 = vsel %vm251_vm1, %v283_v56, inf  ;;  %v284_v60 = vsel %vm1330_vm2, %v1179_v9, 100000.0  ;;  %v903_v63 = vsel %vm209_vm14, 1.0, %v1078_v14  ;;  %v908_v1 = vsel %vm214_vm6, 1.0, %v1078_v14 }
  0x28   : > { %923 = vmatmul.msk.f32.gmra.mxu2 %vm251_vm1, %v344_v29  ;;  %929 = vmatmul.msk.f32.gmra.mxu3 %vm251_vm1, %v349_v32  ;;  %v288_v61 = vsel %vm1339_vm13, %v1195_v13, 100000.0  ;;  %vm1360_vm5 = vmxor %vm212_vm15, %vm1079_vm4  ;;  %v347_v0 = vmul.f32 %v1179_v9, %v903_v63  ;;  %v296_v2 = vsel %vm251_vm1, %v284_v60, inf  ;;  %v352_v3 = vmul.f32 %v1195_v13, %v908_v1 }
  0x29   : > { %275 = vmin.xlane.f32.xlu1 %v274_v35  ;;  %v308_v4 = vsel %vm251_vm1, %v288_v61, inf  ;;  %v290_v5 = vsel %vm1360_vm5, %v1195_v13, 100000.0  ;;  %vm221_vm15 = vmxor %vm211_vm9, %vm1079_vm4 }
  0x2a   : > { %vm218_vm3 = vmxor %vm208_vm10, %vm1079_vm4  ;;  %v314_v6 = vsel %vm251_vm1, %v290_v5, inf  ;;  %v289_v12 = vsel %vm221_vm15, %v1195_v13, 100000.0 }
  0x2b   : > { %v286_v7 = vsel %vm218_vm3, %v1179_v9, 100000.0  ;;  %vm219_vm9 = vmxor %vm209_vm14, %vm1079_vm4  ;;  %v311_v14 = vsel %vm251_vm1, %v289_v12, inf }
  0x2c   : > { %v302_v15 = vsel %vm251_vm1, %v286_v7, inf  ;;  %v287_v16 = vsel %vm219_vm9, %v1179_v9, 100000.0  ;;  %vm223_vm7 = vmxor %vm213_vm11, %vm1079_vm4 }
  0x2d   : > { %v305_v17 = vsel %vm264_vm0, %v287_v16, inf  ;;  %v291_v18 = vsel %vm223_vm7, %v1195_v13, 100000.0  ;;  %vm224_vm8 = vmxor %vm214_vm6, %vm1079_vm4 }
  0x2e   : > { %912 = vmatmul.msk.f32.gmra.mxu0 %vm251_vm1, %v901_v38  ;;  %918 = vmatmul.msk.f32.gmra.mxu1 %vm251_vm1, %v906_v40  ;;  %v317_v8 = vsel %vm251_vm1, %v291_v18, inf  ;;  %v292_v9 = vsel %vm224_vm8, %v1195_v13, 100000.0 }
  0x2f   : > { %278 = vmin.xlane.f32.xlu2 %v277_v41  ;;  %266 = vmin.xlane.f32.xlu0 %v265_v43  ;;  %v320_v19 = vsel %vm264_vm0, %v292_v9, inf }
  0x30   : > { %924 = vmatmul.msk.f32.gmra.mxu2 %vm251_vm1, %v345_v39  ;;  %930 = vmatmul.msk.f32.gmra.mxu3 %vm251_vm1, %v350_v42 }
  0x31   : > { %272 = vmin.xlane.f32.xlu1 %v271_v46 }
  0x36   : > { %913 = vmatmul.msk.f32.gmra.mxu0 %vm251_vm1, %v902_v50  ;;  %919 = vmatmul.msk.f32.gmra.mxu1 %vm251_vm1, %v907_v52 }
  0x37   : > { %300 = vmin.xlane.f32.xlu2 %v299_v53  ;;  %281 = vmin.xlane.f32.xlu0 %v280_v55 }
  0x38   : > { %925 = vmatmul.msk.f32.gmra.mxu2 %vm251_vm1, %v346_v51  ;;  %931 = vmatmul.msk.f32.gmra.mxu3 %vm251_vm1, %v351_v54 }
  0x39   : > { %294 = vmin.xlane.f32.xlu1 %v293_v59 }
  0x3e   : > { %914 = vmatmul.msk.f32.gmra.mxu0 %vm251_vm1, %v903_v63  ;;  %920 = vmatmul.msk.f32.gmra.mxu1 %vm251_vm1, %v908_v1 }
  0x3f   : > { %297 = vmin.xlane.f32.xlu2 %v296_v2  ;;  %309 = vmin.xlane.f32.xlu0 %v308_v4 }
  0x40   : > { %926 = vmatmul.msk.f32.gmra.mxu2 %vm251_vm1, %v347_v0  ;;  %932 = vmatmul.msk.f32.gmra.mxu3 %vm251_vm1, %v352_v3 }
  0x41   : > { %315 = vmin.xlane.f32.xlu1 %v314_v6 }
  0x47   : > { %312 = vmin.xlane.f32.xlu2 %v311_v14  ;;  %303 = vmin.xlane.f32.xlu0 %v302_v15 }
  0x49   : > { %306 = vmin.xlane.f32.xlu1 %v305_v17 }
  0x4f   : > { %318 = vmin.xlane.f32.xlu0 %v317_v8 }
  0x51   : > { %321 = vmin.xlane.f32.xlu1 %v320_v19 }
  0x92   : > { %v1419_v22 = vpop.xlane.xlu0 %253  ;;  %v1436_v35 = vpop.xlane.xlu2 %256 }
  0x94   : > { %v1422_v24 = vpop.xlane.xlu1 %269 }
  0x9a   : > { %v1432_v32 = vpop.xlane.xlu0 %259  ;;  %v1470_v4 = vpop.xlane.xlu2 %262 }
  0x9b   : > { %v1414_v11 = vpop.f32.mrf.mxu0  ;;  %v1417_v21 = vpop.f32.mrf.mxu1 }
  0x9c   : > { %v933_v20 = vadd.f32 -1.0, %v1414_v11  ;;  %v938_v10 = vadd.f32 -1.0, %v1417_v21  ;;  %v1439_v36 = vpop.xlane.xlu1 %275  ;;  %vm715_vm14 = vcmp.lt.f32.partialorder %v1414_v11, 1.0  ;;  %vm720_vm15 = vcmp.lt.f32.partialorder %v1417_v21, 1.0 }
  0x9e   : > { %v555_v23 = vmax.f32 %v933_v20, 1e-10  ;;  %v560_v25 = vmax.f32 %v938_v10, 1e-10 }
  0xa0   : > { %994 = vrcp.f32 %v555_v23  ;;  %v576_v39 = vand.u32 2147483648, %v555_v23  ;;  %v574_v43 = vand.u32 2147483647, %v555_v23  ;;  %v646_v48 = vand.u32 2147483648, %v560_v25 }
  0xa1   : > { %996 = vrcp.f32 %v560_v25  ;;  %vm570_vm4 = vweird.f32 %v555_v23  ;;  %v644_v51 = vand.u32 2147483647, %v560_v25  ;;  %vm640_vm11 = vweird.f32 %v560_v25 }
  0xa2   : > { %v577_v54 = vor.u32 1.1754944e-38, %v576_v39  ;;  %vm575_vm12 = vcmp.eq.f32.partialorder %v574_v43, 8.507059e+37  ;;  %v647_v0 = vor.u32 1.1754944e-38, %v646_v48  ;;  %v1465_v1 = vpop.xlane.xlu0 %266 }
  0xa3   : > { %v1424_v13 = vpop.f32.mrf.mxu0  ;;  %v1427_v27 = vpop.f32.mrf.mxu1  ;;  %vm645_vm13 = vcmp.eq.f32.partialorder %v644_v51, 8.507059e+37 }
  0xa4   : > { %v934_v26 = vadd.f32 -1.0, %v1424_v13  ;;  %v939_v28 = vadd.f32 -1.0, %v1427_v27  ;;  %v483_v46 = vpop.f32.mrf.mxu2  ;;  %v530_v62 = vpop.f32.mrf.mxu3  ;;  %vm716_vm7 = vcmp.lt.f32.partialorder %v1424_v13, 1.0 }
  0xa5   : > { %v1473_v5 = vpop.xlane.xlu1 %272 }
  0xa6   : > { %v995_v29 = vpop.eup %994  ;;  %v1430_v30 = vmax.f32 %v934_v26, 1e-10  ;;  %v1434_v33 = vmax.f32 %v939_v28, 1e-10 }
  0xa7   : > { %v997_v31 = vpop.eup %996  ;;  %v566_v34 = vmul.f32 %v995_v29, %v555_v23  ;;  %vm571_vm1 = vweird.f32 %v995_v29 }
  0xa8   : > { %998 = vrcp.f32 %v1430_v30  ;;  %v636_v37 = vmul.f32 %v997_v31, %v560_v25  ;;  %vm641_vm0 = vweird.f32 %v997_v31  ;;  %vm572_vm10 = vmor %vm570_vm4, %vm571_vm1  ;;  %v590_v18 = vand.u32 2147483648, %v1430_v30 }
  0xa9   : > { %1000 = vrcp.f32 %v1434_v33  ;;  %v567_v38 = vsub.f32 1.0, %v566_v34  ;;  %vm1457_vm2 = vmor %vm640_vm11, %vm641_vm0  ;;  %vm584_vm5 = vweird.f32 %v1430_v30  ;;  %v588_v11 = vand.u32 2147483647, %v1430_v30 }
  0xaa   : > { %v637_v40 = vsub.f32 1.0, %v636_v37  ;;  %vm654_vm1 = vweird.f32 %v1434_v33 }
  0xab   : > { %v1442_v41 = vpop.f32.mrf.mxu0  ;;  %v568_v42 = vmul.f32 %v995_v29, %v567_v38  ;;  %v1445_v45 = vpop.f32.mrf.mxu1  ;;  %vm589_vm8 = vcmp.eq.f32.partialorder %v588_v11, 8.507059e+37 }
  0xac   : > { %v935_v44 = vadd.f32 -1.0, %v1442_v41  ;;  %v638_v47 = vmul.f32 %v997_v31, %v637_v40  ;;  %v940_v49 = vadd.f32 -1.0, %v1445_v45  ;;  %v486_v10 = vpop.f32.mrf.mxu2  ;;  %v1509_v38 = vpop.f32.mrf.mxu3 }
  0xad   : > { %v569_v50 = vadd.f32 %v995_v29, %v568_v42  ;;  %v1513_v40 = vpop.xlane.xlu0 %281  ;;  %v658_v42 = vand.u32 2147483647, %v1434_v33 }
  0xae   : > { %v1448_v52 = vpop.eup %998  ;;  %v1450_v53 = vmax.f32 %v935_v44, 1e-10  ;;  %v639_v55 = vadd.f32 %v997_v31, %v638_v47  ;;  %v1454_v57 = vmax.f32 %v940_v49, 1e-10  ;;  %v295_v47 = vpop.xlane.xlu1 %294 }
  0xaf   : > { %v1452_v56 = vpop.eup %1000  ;;  %v573_v58 = vsel %vm572_vm10, %v995_v29, %v569_v50  ;;  %v580_v60 = vmul.f32 %v1448_v52, %v1430_v30  ;;  %vm585_vm6 = vweird.f32 %v1448_v52  ;;  %v660_v29 = vand.u32 2147483648, %v1434_v33 }
  0xb0   : > { %v578_v61 = vsel %vm575_vm12, %v577_v54, %v573_v58  ;;  %v643_v63 = vsel %vm1457_vm2, %v997_v31, %v639_v55  ;;  %1002 = vrcp.f32 %v1450_v53  ;;  %v650_v3 = vmul.f32 %v1452_v56, %v1434_v33  ;;  %vm1495_vm3 = vmor %vm584_vm5, %vm585_vm6 }
  0xb1   : > { %v581_v2 = vsub.f32 1.0, %v580_v60  ;;  %1004 = vrcp.f32 %v1454_v57  ;;  %v705_v6 = vmul.f32 %v578_v61, %v483_v46  ;;  %v648_v12 = vsel %vm645_vm13, %v647_v0, %v643_v63  ;;  %v1521_v46 = vpop.xlane.xlu2 %278 }
  0xb2   : > { %v710_v17 = vmul.f32 %v648_v12, %v530_v62  ;;  %v651_v8 = vsub.f32 1.0, %v650_v3  ;;  %v591_v30 = vor.u32 1.1754944e-38, %v590_v18  ;;  %vm655_vm4 = vweird.f32 %v1452_v56 }
  0xb3   : > { %v1475_v7 = vpop.f32.mrf.mxu0  ;;  %v582_v14 = vmul.f32 %v1448_v52, %v581_v2  ;;  %v1480_v16 = vpop.f32.mrf.mxu1  ;;  %v725_v20 = vsel %vm715_vm14, 100000.0, %v705_v6  ;;  %v602_v55 = vand.u32 2147483647, %v1450_v53  ;;  %vm1538_vm11 = vcmp.eq.f32.partialorder %v658_v42, 8.507059e+37  ;;  %vm1547_vm2 = vmor %vm654_vm1, %vm655_vm4 }
  0xb4   : > { %v936_v15 = vadd.f32 -1.0, %v1475_v7  ;;  %v941_v19 = vadd.f32 -1.0, %v1480_v16  ;;  %vm735_vm9 = vcmp.lt.f32.partialorder %v725_v20, %v1419_v22  ;;  %v730_v31 = vsel %vm720_vm15, 100000.0, %v710_v17  ;;  %v489_v3 = vpop.f32.mrf.mxu2  ;;  %v536_v13 = vpop.f32.mrf.mxu3 }
  0xb5   : > { %v583_v23 = vadd.f32 %v1448_v52, %v582_v14  ;;  %v652_v37 = vmul.f32 %v1452_v56, %v651_v8  ;;  %v745_v48 = vsel %vm735_vm9, 100000.0, %v725_v20  ;;  %vm740_vm0 = vcmp.lt.f32.partialorder %v730_v31, %v1422_v24  ;;  %v310_v28 = vpop.xlane.xlu0 %309 }
  0xb6   : > { %v1484_v9 = vmax.f32 %v936_v15, 1e-10  ;;  %v1488_v25 = vpop.eup %1002  ;;  %v1507_v21 = vmax.f32 %v941_v19, 1e-10  ;;  %v604_v22 = vand.u32 2147483648, %v1450_v53  ;;  %vm755_vm10 = vcmp.gt.f32.partialorder %v745_v48, %v295_v47 }
  0xb7   : > { %v1492_v26 = vpop.eup %1004  ;;  %v587_v34 = vsel %vm1495_vm3, %v1448_v52, %v583_v23  ;;  %v594_v39 = vmul.f32 %v1488_v25, %v1450_v53  ;;  %v1528_v51 = vadd.f32 %v1452_v56, %v652_v37  ;;  %v661_v52 = vor.u32 1.1754944e-38, %v660_v29 }
  0xb8   : > { %1006 = vrcp.f32 %v1484_v9  ;;  %v664_v44 = vmul.f32 %v1492_v26, %v1454_v57  ;;  %v592_v49 = vsel %vm589_vm8, %v591_v30, %v587_v34  ;;  %v1536_v24 = vsel %vm740_vm0, 100000.0, %v730_v31 }
  0xb9   : > { %1008 = vrcp.f32 %v1507_v21  ;;  %v595_v58 = vsub.f32 1.0, %v594_v39  ;;  %v706_v60 = vmul.f32 %v592_v49, %v486_v10  ;;  %vm598_vm12 = vweird.f32 %v1450_v53  ;;  %v1590_v34 = vpop.xlane.xlu2 %300 }
  0xba   : > { %v665_v59 = vsub.f32 1.0, %v664_v44  ;;  %vm599_vm13 = vweird.f32 %v1488_v25  ;;  %vm717_vm14 = vcmp.lt.f32.partialorder %v1442_v41, 1.0  ;;  %vm775_vm6 = vcmask 130048  }
  0xbb   : > { %v1517_v43 = vpop.f32.mrf.mxu0  ;;  %v1531_v54 = vpop.f32.mrf.mxu1  ;;  %v596_v6 = vmul.f32 %v1488_v25, %v595_v58  ;;  %v657_v33 = vsel %vm1547_vm2, %v1452_v56, %v1528_v51  ;;  %vm1561_vm5 = vcmp.eq.f32.partialorder %v602_v55, 8.507059e+37  ;;  %vm669_vm15 = vweird.f32 %v1492_v26  ;;  %vm600_vm3 = vmor %vm598_vm12, %vm599_vm13 }
  0xbc   : > { %v937_v50 = vadd.f32 -1.0, %v1517_v43  ;;  %v942_v2 = vadd.f32 -1.0, %v1531_v54  ;;  %v666_v14 = vmul.f32 %v1492_v26, %v665_v59  ;;  %v605_v17 = vor.u32 1.1754944e-38, %v604_v22  ;;  %v1612_v58 = vpop.xlane.xlu1 %315  ;;  %v492_v22 = vpop.f32.mrf.mxu2 }
  0xbd   : > { %v597_v15 = vadd.f32 %v1488_v25, %v596_v6  ;;  %v672_v18 = vand.u32 2147483647, %v1454_v57  ;;  %v674_v8 = vand.u32 2147483648, %v1454_v57  ;;  %v726_v19 = vsel %vm716_vm7, 100000.0, %v706_v60 }
  0xbe   : > { %v1543_v62 = vpop.eup %1006  ;;  %v1551_v0 = vmax.f32 %v937_v50, 1e-10  ;;  %v667_v56 = vadd.f32 %v1492_v26, %v666_v14  ;;  %vm668_vm9 = vweird.f32 %v1454_v57  ;;  %v1581_v23 = vmax.f32 %v942_v2, 1e-10  ;;  %v304_v14 = vpop.xlane.xlu0 %303 }
  0xbf   : > { %v608_v20 = vmul.f32 %v1543_v62, %v1484_v9  ;;  %v1578_v10 = vpop.eup %1008  ;;  %v601_v11 = vsel %vm600_vm3, %v1488_v25, %v597_v15  ;;  %vm670_vm7 = vmor %vm668_vm9, %vm669_vm15  ;;  %v675_v53 = vor.u32 1.1754944e-38, %v674_v8  ;;  %vm673_vm8 = vcmp.eq.f32.partialorder %v672_v18, 8.507059e+37 }
  0xc0   : > { %1010 = vrcp.f32 %v1551_v0  ;;  %v606_v57 = vsel %vm1561_vm5, %v605_v17, %v601_v11  ;;  %v671_v29 = vsel %vm670_vm7, %v1492_v26, %v667_v56  ;;  %vm722_vm1 = vcmp.lt.f32.partialorder %v1445_v45, 1.0 }
  0xc1   : > { %v609_v31 = vsub.f32 1.0, %v608_v20  ;;  %vm718_vm0 = vcmp.lt.f32.partialorder %v1475_v7, 1.0  ;;  %v707_v25 = vmul.f32 %v606_v57, %v489_v3  ;;  %v676_v37 = vsel %vm673_vm8, %v675_v53, %v671_v29 }
  0xc2   : > { %v616_v30 = vand.u32 2147483647, %v1484_v9  ;;  %v618_v39 = vand.u32 2147483648, %v1484_v9  ;;  %vm721_vm4 = vcmp.lt.f32.partialorder %v1427_v27, 1.0  ;;  %v765_v42 = vsel %vm755_vm10, 100000.0, %v745_v48 }
  0xc3   : > { %v610_v26 = vmul.f32 %v1543_v62, %v609_v31  ;;  %vm613_vm12 = vweird.f32 %v1543_v62  ;;  %v678_v44 = vmul.f32 %v1578_v10, %v1507_v21  ;;  %vm760_vm2 = vcmp.gt.f32.partialorder %v1536_v24, %v310_v28 }
  0xc4   : > { %vm736_vm13 = vcmp.lt.f32.partialorder %v726_v19, %v1436_v35  ;;  %v662_v49 = vsel %vm1538_vm11, %v661_v52, %v657_v33  ;;  %1012 = vrcp.f32 %v1581_v23  ;;  %v712_v50 = vmul.f32 %v676_v37, %v536_v13  ;;  %v298_v35 = vpop.xlane.xlu2 %297  ;;  %v307_v13 = vpop.xlane.xlu1 %306 }
  0xc5   : > { %v611_v47 = vadd.f32 %v1543_v62, %v610_v26  ;;  %vm612_vm10 = vweird.f32 %v1484_v9  ;;  %v679_v48 = vsub.f32 1.0, %v678_v44  ;;  %v727_v55 = vsel %vm717_vm14, 100000.0, %v707_v25  ;;  %v495_v57 = vpop.f32.mrf.mxu2 }
  0xc6   : > { %v1608_v51 = vpop.eup %1010  ;;  %vm614_vm5 = vmor %vm612_vm10, %vm613_vm12  ;;  %vm617_vm15 = vcmp.eq.f32.partialorder %v616_v30, 8.507059e+37  ;;  %v619_v59 = vor.u32 1.1754944e-38, %v618_v39  ;;  %v688_v52 = vand.u32 2147483648, %v1507_v21  ;;  %vm683_vm11 = vweird.f32 %v1578_v10  ;;  %v319_v39 = vpop.xlane.xlu0 %318 }
  0xc7   : > { %v615_v60 = vsel %vm614_vm5, %v1543_v62, %v611_v47  ;;  %v680_v61 = vmul.f32 %v1578_v10, %v679_v48  ;;  %v686_v9 = vand.u32 2147483647, %v1507_v21  ;;  %vm723_vm3 = vcmp.lt.f32.partialorder %v1480_v16, 1.0 }
  0xc8   : > { %v1621_v41 = vsel %vm775_vm6, %v765_v42, inf  ;;  %v711_v63 = vmul.f32 %v662_v49, %v1509_v38  ;;  %v620_v2 = vsel %vm617_vm15, %v619_v59, %v615_v60  ;;  %vm737_vm14 = vcmp.lt.f32.partialorder %v727_v55, %v1432_v32  ;;  %v539_v38 = vpop.f32.mrf.mxu3 }
  0xc9   : > { %v708_v3 = vmul.f32 %v620_v2, %v492_v22  ;;  %v681_v6 = vadd.f32 %v1578_v10, %v680_v61  ;;  %vm682_vm9 = vweird.f32 %v1507_v21  ;;  %v1632_v33 = vsel %vm760_vm2, 100000.0, %v1536_v24 }
  0xca   : > { %v1627_v62 = vpop.eup %1012  ;;  %v746_v12 = vsel %vm736_vm13, 100000.0, %v726_v19  ;;  %vm684_vm7 = vmor %vm682_vm9, %vm683_vm11  ;;  %v689_v15 = vor.u32 1.1754944e-38, %v688_v52  ;;  %v622_v17 = vmul.f32 %v1608_v51, %v1551_v0  ;;  %v732_v21 = vsel %vm722_vm1, 100000.0, %v712_v50 }
  0xcb   : > { %v728_v18 = vsel %vm718_vm0, 100000.0, %v708_v3  ;;  %v685_v24 = vsel %vm684_vm7, %v1578_v10, %v681_v6  ;;  %vm687_vm8 = vcmp.eq.f32.partialorder %v686_v9, 8.507059e+37  ;;  %v731_v8 = vsel %vm721_vm4, 100000.0, %v711_v63 }
  0xcc   : > { %v747_v19 = vsel %vm737_vm14, 100000.0, %v727_v55  ;;  %v690_v56 = vsel %vm687_vm8, %v689_v15, %v685_v24  ;;  %v623_v20 = vsub.f32 1.0, %v622_v17  ;;  %vm719_vm12 = vcmp.lt.f32.partialorder %v1517_v43, 1.0  ;;  %v313_v47 = vpop.xlane.xlu2 %312  ;;  %v322_v63 = vpop.xlane.xlu1 %321 }
  0xcd   : > { %vm738_vm2 = vcmp.lt.f32.partialorder %v728_v18, %v1470_v4  ;;  %v713_v45 = vmul.f32 %v690_v56, %v539_v38  ;;  %v630_v7 = vand.u32 2147483647, %v1551_v0  ;;  %v632_v11 = vand.u32 2147483648, %v1551_v0 }
  0xce   : > { %vm742_vm1 = vcmp.lt.f32.partialorder %v732_v21, %v1439_v36  ;;  %v624_v10 = vmul.f32 %v1608_v51, %v623_v20  ;;  %vm627_vm0 = vweird.f32 %v1608_v51  ;;  %v692_v27 = vmul.f32 %v1627_v62, %v1581_v23 }
  0xcf   : > { %vm756_vm4 = vcmp.gt.f32.partialorder %v746_v12, %v298_v35  ;;  %vm741_vm13 = vcmp.lt.f32.partialorder %v731_v8, %v1473_v5  ;;  %vm757_vm10 = vcmp.gt.f32.partialorder %v747_v19, %v1590_v34  ;;  %v733_v32 = vsel %vm723_vm3, 100000.0, %v713_v45 }
  0xd0   : > { %v748_v4 = vsel %vm738_vm2, 100000.0, %v728_v18  ;;  %v625_v53 = vadd.f32 %v1608_v51, %v624_v10  ;;  %vm626_vm5 = vweird.f32 %v1551_v0  ;;  %v693_v36 = vsub.f32 1.0, %v692_v27  ;;  %v542_v34 = vpop.f32.mrf.mxu3 }
  0xd1   : > { %v752_v28 = vsel %vm742_vm1, 100000.0, %v732_v21  ;;  %vm743_vm15 = vcmp.lt.f32.partialorder %v733_v32, %v1521_v46  ;;  %vm628_vm11 = vmor %vm626_vm5, %vm627_vm0  ;;  %vm631_vm14 = vcmp.eq.f32.partialorder %v630_v7, 8.507059e+37  ;;  %v633_v29 = vor.u32 1.1754944e-38, %v632_v11 }
  0xd2   : > { %v629_v31 = vsel %vm628_vm11, %v1608_v51, %v625_v53  ;;  %v694_v25 = vmul.f32 %v1627_v62, %v693_v36  ;;  %vm697_vm3 = vweird.f32 %v1627_v62  ;;  %v700_v16 = vand.u32 2147483647, %v1581_v23 }
  0xd3   : > { %v767_v37 = vsel %vm757_vm10, 100000.0, %v747_v19  ;;  %vm758_vm9 = vcmp.gt.f32.partialorder %v748_v4, %v304_v14  ;;  %v634_v0 = vsel %vm631_vm14, %v633_v29, %v629_v31  ;;  %v702_v30 = vand.u32 2147483648, %v1581_v23 }
  0xd4   : > { %v753_v46 = vsel %vm743_vm15, 100000.0, %v733_v32  ;;  %v709_v42 = vmul.f32 %v634_v0, %v495_v57  ;;  %v695_v26 = vadd.f32 %v1627_v62, %v694_v25  ;;  %vm696_vm7 = vweird.f32 %v1581_v23 }
  0xd5   : > { %v766_v44 = vsel %vm756_vm4, 100000.0, %v746_v12  ;;  %v751_v49 = vsel %vm741_vm13, 100000.0, %v731_v8  ;;  %vm762_vm8 = vcmp.gt.f32.partialorder %v752_v28, %v1612_v58  ;;  %vm698_vm2 = vmor %vm696_vm7, %vm697_vm3  ;;  %v703_v50 = vor.u32 1.1754944e-38, %v702_v30 }
  0xd6   : > { %v768_v48 = vsel %vm758_vm9, 100000.0, %v748_v4  ;;  %v729_v51 = vsel %vm719_vm12, 100000.0, %v709_v42  ;;  %v699_v55 = vsel %vm698_vm2, %v1627_v62, %v695_v26  ;;  %vm701_vm1 = vcmp.eq.f32.partialorder %v700_v16, 8.507059e+37 }
  0xd7   : > { %v778_v23 = vsel %vm775_vm6, %v767_v37, inf  ;;  %vm763_vm0 = vcmp.gt.f32.partialorder %v753_v46, %v319_v39  ;;  %vm739_vm4 = vcmp.lt.f32.partialorder %v729_v51, %v1465_v1  ;;  %v704_v5 = vsel %vm701_vm1, %v703_v50, %v699_v55 }
  0xd8   : > { %v772_v58 = vsel %vm762_vm8, 100000.0, %v752_v28  ;;  %v749_v22 = vsel %vm739_vm4, 100000.0, %v729_v51  ;;  %vm782_vm13 = vcmask 122880   ;;  %v714_v59 = vmul.f32 %v704_v5, %v542_v34 }
  0xd9   : > { %vm724_vm10 = vcmp.lt.f32.partialorder %v1531_v54, 1.0  ;;  %vm761_vm5 = vcmp.gt.f32.partialorder %v751_v49, %v313_v47  ;;  %v780_v52 = vsel %vm775_vm6, %v768_v48, inf  ;;  %vm759_vm15 = vcmp.gt.f32.partialorder %v749_v22, %v307_v13 }
  0xda   : > { %v779_v43 = vmin.f32 %v1621_v41, %v778_v23  ;;  %v773_v60 = vsel %vm763_vm0, 100000.0, %v753_v46  ;;  %v769_v61 = vsel %vm759_vm15, 100000.0, %v749_v22  ;;  %v734_v9 = vsel %vm724_vm10, 100000.0, %v714_v59 }
  0xdb   : > { %v777_v2 = vsel %vm775_vm6, %v766_v44, inf  ;;  %v794_v1 = vsel %vm775_vm6, %v772_v58, inf  ;;  %v783_v3 = vsel %vm782_vm13, %v769_v61, inf  ;;  %vm744_vm12 = vcmp.lt.f32.partialorder %v734_v9, %v1513_v40 }
  0xdc   : > { %v771_v54 = vsel %vm761_vm5, 100000.0, %v751_v49  ;;  %v781_v6 = vmin.f32 %v777_v2, %v780_v52  ;;  %v784_v62 = vmin.f32 %v779_v43, %v783_v3  ;;  %v754_v12 = vsel %vm744_vm12, 100000.0, %v734_v9 }
  0xdd   : > { %v792_v41 = vsel %vm775_vm6, %v1632_v33, inf  ;;  %v796_v14 = vsel %vm775_vm6, %v773_v60, inf  ;;  %vm764_vm11 = vcmp.gt.f32.partialorder %v754_v12, %v322_v63  ;;  %v793_v21 = vsel %vm775_vm6, %v771_v54, inf }
  0xde   : > { %v795_v38 = vmin.f32 %v792_v41, %v794_v1  ;;  %v785_v15 = vmin.f32 %v784_v62, %v781_v6  ;;  %v774_v17 = vsel %vm764_vm11, 100000.0, %v754_v12  ;;  %v797_v40 = vmin.f32 %v793_v21, %v796_v14 }
  0xdf   : > { %v798_v18 = vsel %vm782_vm13, %v774_v17, inf }
  0xe0   : > { %v786_v24 = vrot.slane %v785_v15, 4  ;;  %v799_v35 = vmin.f32 %v795_v38, %v798_v18 }
  0xe2   : > { %v787_v8 = vmin.f32 %v785_v15, %v786_v24  ;;  %v800_v19 = vmin.f32 %v799_v35, %v797_v40 }
  0xe4   : > { %v788_v56 = vrot.slane %v787_v8, 2  ;;  %v801_v20 = vrot.slane %v800_v19, 4 }
  0xe6   : > { %v789_v33 = vmin.f32 %v787_v8, %v788_v56  ;;  %v802_v45 = vmin.f32 %v800_v19, %v801_v20 }
  0xe8   : > { %v790_v7 = vrot.slane %v789_v33, 1  ;;  %v803_v11 = vrot.slane %v802_v45, 2 }
  0xea   : > { %v791_v10 = vmin.f32 %v789_v33, %v790_v7  ;;  %v804_v27 = vmin.f32 %v802_v45, %v803_v11 }
  0xec   : > { %v805_v32 = vrot.slane %v804_v27, 1  ;;  %807 = vst.msk [vmem:[%s176_s29] sm:$0x1] %vm782_vm13, %v791_v10 }
  0xee   : > { %v806_v4 = vmin.f32 %v804_v27, %v805_v32 }
  0xf0   : > { %808 = vst.msk [vmem:[%s176_s29 + $0x1] sm:$0x1] %vm782_vm13, %v806_v4 }
  0xf1   : > { %1041 = shalt.err (!%p1038_p3)
}
  0xf2   : > { %s1080_s16 = smov 16   ;;  %s1081_s17 = smov 1  }
  0xf3   : > { %947 = dma.vmem_to_hbm [thread:$0]  (%p1137_p5), %s822_s30, 32, %s824_s4, %s810_s5, %s1080_s16, %s1080_s16, %s1081_s17  }
  0xf4 PF: > { %p953_p4 = scmp.ge.s32.totalorder %s1076_s15, 2  ;;  %s838_s19 = sand.u32 1, %s1064_s12  }
  0xf5   : > { %s839_s20 = scalar_lea.sflag [#allocation3], %s838_s19 }
  0xf6   : > { %p950_p7 = pnand %p953_p4, %p1141_p6 }
  0xf8   : > { %p951_p8 = pneg %p950_p7 }
  0xfa   : > { %1059 = dma.done.wait (%p951_p8), %s839_s20, 32  }
  0xfb   : > { %1061 = vsyncadd (%p951_p8), %s839_s20, 4294967264  ;;  %p13_p9 = scmp.ge.s32.totalorder %s1125_s18, 4   ;;  %s1757_s12 = smov %s1068_s13 }
  0xfc   : > { %s1758_s13 = smov %s1072_s14  ;;  %s1759_s14 = smov %s1135_s21 }
  0xfd   : > { %s1760_s15 = smov %s1125_s18  ;;  %15 = sbr.rel (!%p13_p9) target bundleno = 3 (0x3), region = 70 }
 0x102   :  { %845 = vsyncpa [#allocation3], 1 }
 0x103   :  { %847 = vsyncpa [#allocation3 + $0x1], 1 }

</bundles_post_ra>
